<compile_context>
chip_gen: v7x
topology: tpu7x:2x2x1
jax: 0.10.0
libtpu: 0.0.40
codegen_flags: <defaults>
</compile_context>

<pallas_src>
import functools

import jax
import jax.numpy as jnp
from jax.experimental import pallas as pl
from jax.experimental.pallas import tpu as pltpu


def _round_up(x, m):
    return (x + m - 1) // m * m


def _sse_partial_kernel(n_rows, tm, pred_ref, tgt_ref, out_ref):
    """Accumulate partial sums of (pred - tgt)^2 into the resident (8, D) out block."""
    c = pl.program_id(0)            # row-split ("core") axis, parallel
    i = pl.program_id(1)            # streaming axis, arbitrary (sequential)
    steps = pl.num_programs(1)

    @pl.when(i == 0)
    def _init():
        out_ref[...] = jnp.zeros_like(out_ref)

    # Unclamped global row offset of this block; rows >= n_rows are masked out.
    # This covers both the ragged tail block and any clamped duplicate block.
    start_row = (c * steps + i) * tm
    row_ids = start_row + jax.lax.broadcasted_iota(jnp.int32, (tm, 1), 0)
    valid = row_ids < n_rows

    diff = pred_ref[...].astype(jnp.float32) - tgt_ref[...].astype(jnp.float32)
    sq = jnp.where(valid, diff * diff, 0.0)

    # Fold rows into the (8, D) accumulator: pure elementwise VPU adds per step;
    # the expensive cross-lane/sublane reduction is done once, outside the loop.
    d = sq.shape[-1]
    out_ref[...] += jnp.sum(sq.reshape(tm // 8, 8, d), axis=0)


def custom_loss(real_outputs, targets, distance, coeff, *, tm=None):
    """MSE(real_outputs, targets) + coeff * distance  (forward of CustomLossFunction)."""
    n, d = real_outputs.shape
    assert targets.shape == (n, d)

    # Row tile: aim for ~1 MiB of f32 per streamed block (measured ~85% of HBM
    # roofline), multiple of 8, never larger than the (8-rounded) row count.
    if tm is None:
        tm = max(8, ((1 << 20) // (d * 4)) // 8 * 8)
    tm = max(8, (min(tm, _round_up(n, 8)) // 8) * 8)

    num_blocks = -(-n // tm)                       # cdiv
    n_splits = 2 if num_blocks >= 2 else 1         # v7x: one split per TensorCore
    steps = -(-num_blocks // n_splits)             # cdiv
    last_block = num_blocks - 1

    def _in_map(c, i):
        # Clamp so we never request a fully out-of-bounds block; duplicated
        # blocks are zeroed by the row mask inside the kernel.
        return (jnp.minimum(c * steps + i, last_block), 0)

    in_bytes = real_outputs.dtype.itemsize
    kernel = functools.partial(_sse_partial_kernel, n, tm)

    partials = pl.pallas_call(
        kernel,
        out_shape=jax.ShapeDtypeStruct((n_splits * 8, d), jnp.float32),
        grid=(n_splits, steps),
        in_specs=[
            pl.BlockSpec((tm, d), _in_map),
            pl.BlockSpec((tm, d), _in_map),
        ],
        out_specs=pl.BlockSpec((8, d), lambda c, i: (c, 0)),
        compiler_params=pltpu.CompilerParams(
            dimension_semantics=("parallel", "arbitrary"),
            vmem_limit_bytes=32 * 1024 * 1024,
        ),
        cost_estimate=pl.CostEstimate(
            flops=3 * n * d,
            transcendentals=0,
            bytes_accessed=2 * n * d * in_bytes + n_splits * 8 * d * 4,
        ),
    )(real_outputs, targets)

    # Tiny scalar epilogue (single cross-lane reduce of <= 16*D elements plus
    # the coeff*distance fuse) — kept out of the bandwidth-bound kernel loop.
    sse = jnp.sum(partials)
    mse = sse * (1.0 / float(n * d))
    return mse + coeff * jnp.asarray(distance, dtype=jnp.float32)


if __name__ == "__main__":
    key = jax.random.PRNGKey(0)
    k1, k2, k3 = jax.random.split(key, 3)

    # Small shapes consistent with the module: (batch*seq, hidden) = (44, 64).
    # Deliberately ragged so the tail-mask / clamped-block paths are exercised.
    N, D = 44, 64
    real_outputs = jax.random.normal(k1, (N, D), dtype=jnp.float32)
    targets = jax.random.normal(k2, (N, D), dtype=jnp.float32)
    distance = jax.random.uniform(k3, (), dtype=jnp.float32)  # scalar distance
    coeff = 0.5  # deterministic "parameter" of the module

    # Pure-JAX reference (MSE + coeff * distance).
    ref = jnp.mean((real_outputs - targets) ** 2) + coeff * distance

    # Small explicit tile: multi-step grid, 2-way row split, ragged tail mask,
    # clamped duplicate block.
    out_small = jax.block_until_ready(
        custom_loss(real_outputs, targets, distance, coeff, tm=16))
    # Auto tile (single large block for this size).
    out_auto = jax.block_until_ready(
        custom_loss(real_outputs, targets, distance, coeff))

    assert jnp.allclose(out_small, ref, rtol=1e-5, atol=1e-5), (out_small, ref)
    assert jnp.allclose(out_auto, ref, rtol=1e-5, atol=1e-5), (out_auto, ref)
    print("KERNEL_OK")
</pallas_src>

<mosaic_0001>
module attributes {stable_mosaic.version = 11 : i64} {
  func.func @_sse_partial_kernel(%arg0: i32, %arg1: i32, %arg2: memref<16x64xf32, #tpu.memory_space<vmem>>, %arg3: memref<16x64xf32, #tpu.memory_space<vmem>>, %arg4: memref<8x64xf32, #tpu.memory_space<vmem>>) attributes {dimension_semantics = [#tpu.dimension_semantics<parallel>, #tpu.dimension_semantics<arbitrary>], iteration_bounds = array<i64: 2, 2>, scalar_prefetch = 0 : i64, scratch_operands = 0 : i64, tpu.core_type = #tpu.core_type<tc>, window_params = [{transform_indices = @transform_0, window_bounds = array<i64: 16, 64>}, {transform_indices = @transform_1, window_bounds = array<i64: 16, 64>}, {transform_indices = @transform_2, window_bounds = array<i64: 8, 64>}]} {
    %c0_i32 = arith.constant 0 : i32
    %0 = arith.cmpi eq, %arg1, %c0_i32 : i32
    %1 = arith.extui %0 : i1 to i32
    %c0_i32_0 = arith.constant 0 : i32
    %2 = arith.cmpi ne, %1, %c0_i32_0 : i32
    scf.if %2 {
      %cst_9 = arith.constant 0.000000e+00 : f32
      %24 = vector.broadcast %cst_9 : f32 to vector<8x64xf32>
      %c0_10 = arith.constant 0 : index
      %c0_11 = arith.constant 0 : index
      %25 = vector.load %arg4[%c0_10, %c0_11] : memref<8x64xf32, #tpu.memory_space<vmem>>, vector<8x64xf32>
      tpu.vector_store %arg4[%c0_10, %c0_11], %24 {strides = array<i32>} : memref<8x64xf32, #tpu.memory_space<vmem>>, vector<8x64xf32>,
    } else {
    }
    %c2_i32 = arith.constant 2 : i32
    %3 = arith.muli %arg0, %c2_i32 : i32
    %4 = arith.addi %3, %arg1 : i32
    %c16_i32 = arith.constant 16 : i32
    %5 = arith.muli %4, %c16_i32 : i32
    %6 = tpu.iota {dimensions = array<i32: 0>} : vector<16x1xi32>
    %7 = vector.broadcast %5 : i32 to vector<16x1xi32>
    %8 = arith.addi %7, %6 : vector<16x1xi32>
    %c44_i32 = arith.constant 44 : i32
    %9 = vector.broadcast %c44_i32 : i32 to vector<16x1xi32>
    %10 = arith.cmpi slt, %8, %9 : vector<16x1xi32>
    %c0 = arith.constant 0 : index
    %c0_1 = arith.constant 0 : index
    %11 = vector.load %arg2[%c0, %c0_1] : memref<16x64xf32, #tpu.memory_space<vmem>>, vector<16x64xf32>
    %c0_2 = arith.constant 0 : index
    %c0_3 = arith.constant 0 : index
    %12 = vector.load %arg3[%c0_2, %c0_3] : memref<16x64xf32, #tpu.memory_space<vmem>>, vector<16x64xf32>
    %13 = arith.subf %11, %12 : vector<16x64xf32>
    %14 = arith.mulf %13, %13 : vector<16x64xf32>
    %cst = arith.constant 0.000000e+00 : f32
    %15 = vector.shape_cast %10 : vector<16x1xi1> to vector<16x1xi1>
    %16 = vector.broadcast %15 : vector<16x1xi1> to vector<16x64xi1>
    %17 = vector.broadcast %cst : f32 to vector<16x64xf32>
    %18 = arith.select %16, %14, %17 : vector<16x64xi1>, vector<16x64xf32>
    %c0_4 = arith.constant 0 : index
    %c0_5 = arith.constant 0 : index
    %19 = vector.load %arg4[%c0_4, %c0_5] : memref<8x64xf32, #tpu.memory_space<vmem>>, vector<8x64xf32>
    %20 = vector.shape_cast %18 : vector<16x64xf32> to vector<2x8x64xf32>
    %cst_6 = arith.constant dense<0.000000e+00> : vector<8x64xf32>
    %21 = vector.multi_reduction <add>, %20, %cst_6 [0] : vector<2x8x64xf32> to vector<8x64xf32>
    %22 = arith.addf %19, %21 : vector<8x64xf32>
    %c0_7 = arith.constant 0 : index
    %c0_8 = arith.constant 0 : index
    %23 = vector.load %arg4[%c0_7, %c0_8] : memref<8x64xf32, #tpu.memory_space<vmem>>, vector<8x64xf32>
    tpu.vector_store %arg4[%c0_7, %c0_8], %22 {strides = array<i32>} : memref<8x64xf32, #tpu.memory_space<vmem>>, vector<8x64xf32>,
    return
  }
  func.func @transform_0(%arg0: i32, %arg1: i32) -> (i32, i32) {
    %c2_i32 = arith.constant 2 : i32
    %0 = arith.muli %arg0, %c2_i32 : i32
    %1 = arith.addi %0, %arg1 : i32
    %c2_i32_0 = arith.constant 2 : i32
    %2 = arith.minsi %1, %c2_i32_0 : i32
    %c0_i32 = arith.constant 0 : i32
    %c0_i32_1 = arith.constant 0 : i32
    return %2, %c0_i32 : i32, i32
  }
  func.func @transform_1(%arg0: i32, %arg1: i32) -> (i32, i32) {
    %c2_i32 = arith.constant 2 : i32
    %0 = arith.muli %arg0, %c2_i32 : i32
    %1 = arith.addi %0, %arg1 : i32
    %c2_i32_0 = arith.constant 2 : i32
    %2 = arith.minsi %1, %c2_i32_0 : i32
    %c0_i32 = arith.constant 0 : i32
    %c0_i32_1 = arith.constant 0 : i32
    return %2, %c0_i32 : i32, i32
  }
  func.func @transform_2(%arg0: i32, %arg1: i32) -> (i32, i32) {
    %c0_i32 = arith.constant 0 : i32
    %c0_i32_0 = arith.constant 0 : i32
    return %arg0, %c0_i32 : i32, i32
  }
}

</mosaic_0001>

<bundles_post_ra>
// kernel: tpu_custom_call.1
= control target key start
LH: loop header
LB: loop body
LE: loop exit
PB: predicated region body
PF: predicated region fallthrough
CT: control target
= control target key end

     0   :  { %s1055_s0 = inlined_call_operand.hbm [shape: f32[44,64], index: 0, kind: input, shape index: {}]   ;;  %s1056_s1 = inlined_call_operand.hbm [shape: f32[44,64], index: 1, kind: input, shape index: {}]   ;;  %s1057_s2 = inlined_call_operand.hbm [shape: f32[16,64], index: 2, kind: output, shape index: {}]  }
   0x1   :  { %1066 = sst [smem:[#allocation15_spill]] %s1055_s0 }
   0x2   :  { %7 = vsyncpa [#allocation3], 0 }
   0x3   :  { %9 = vsyncpa [#allocation3 + $0x1], 0 }
   0x4   :  { %10 = vsyncpa [#allocation6], 0 }
   0x5   :  { %12 = vsyncpa [#allocation6 + $0x1], 0 }
   0x6   :  { %13 = vsyncpa [#allocation4], 0 }
   0x7   :  { %15 = vsyncpa [#allocation4 + $0x1], 0  ;;  %s752_s9 = smov 0   ;;  %s754_s10 = smov 0  }
   0x8   :  { %s756_s11 = smov 0   ;;  %s758_s12 = smov 0  }
   0x9   :  { %s760_s13 = smov 0   ;;  %s762_s14 = smov 0  }
   0xa   :  { %s764_s15 = smov 0   ;;  %s766_s16 = smov 0  }
   0xb   :  { %s768_s17 = smov 0   ;;  %s770_s18 = smov 0  }
   0xc   :  { %s772_s19 = smov 0  }
   0xd LB: > { %1067 = sst [smem:[#allocation11_spill]] %s721_s17  ;;  %s404_s20 = sadd.s32 4294967295, %s729_s19   ;;  %s729_s19 = sphi %s772_s19, %s21_s19   ;;  %s725_s18 = sphi %s770_s18, %s1087_s18   ;;  %s721_s17 = sphi %s768_s17, %s1086_s17   ;;  %s717_s16 = sphi %s766_s16, %s1085_s16   ;;  %s713_s15 = sphi %s764_s15, %s1084_s15   ;;  %s709_s14 = sphi %s762_s14, %s1093_s14   ;;  %s705_s13 = sphi %s760_s13, %s1092_s13   ;;  %s701_s12 = sphi %s758_s12, %s1091_s12   ;;  %s697_s11 = sphi %s756_s11, %s1090_s11   ;;  %s693_s10 = sphi %s754_s10, %s1089_s10   ;;  %s689_s9 = sphi %s752_s9, %s1088_s9  }
   0xe   : > { %1068 = sst [smem:[#allocation12_spill]] %s725_s18  ;;  %s405_s21 = sadd.s32 4294967294, %s729_s19  }
   0xf   : > { %s30_s22 = sadd.s32 1, %s721_s17  ;;  %s33_s23 = sadd.s32 1, %s725_s18 }
  0x10   : > { %p31_p0 = scmp.ge.s32.totalorder %s30_s22, 2  ;;  %s406_s24 = sshll.u32 %s725_s18, 1 }
  0x11   : > { %s38_s25 = sadd.s32 %s721_s17, %s406_s24  ;;  %s48_s26 = sadd.s32 1, %s709_s14 }
  0x12   : > { %s1095_s22 = smov (%p31_p0, %s30_s22), 0  ;;  %s1097_s23 = smov (!%p31_p0, %s33_s23), %s725_s18 }
  0x13   : > { %1069 = sst [smem:[#allocation13_spill]] %s1095_s22  ;;  %p39_p1 = scmp.lt.s32.totalorder %s38_s25, 2 }
  0x14   : > { %p55_p2 = scmp.ne.s32.totalorder %s709_s14, %s705_s13  ;;  %p35_p3 = scmp.ge.s32.totalorder %s1097_s23, 2 }
  0x15   : > { %p56_p4 = scmp.eq.s32.totalorder %s729_s19, 0  ;;  %s1099_s25 = smov (!%p39_p1, %s38_s25), 2 }
  0x16   : > { %s1101_s23 = smov (%p35_p3, %s1097_s23), 0  ;;  %p61_p6 = scmp.ne.s32.totalorder %s705_s13, %s701_s12 }
  0x17   : > { %1070 = sst [smem:[#allocation14_spill]] %s1101_s23  ;;  %p824_p5 = por %p56_p4, %p55_p2 }
  0x18   : > { %s407_s28 = sshll.u32 %s1101_s23, 1  ;;  %p62_p7 = scmp.eq.s32.totalorder %s404_s20, 0 }
  0x19   : > { %s42_s29 = sadd.s32 %s407_s28, %s1095_s22  ;;  %s105_s30 = ssub.s32 %s725_s18, %s1101_s23 }
  0x1a   : > { %p43_p8 = scmp.lt.s32.totalorder %s42_s29, 2  ;;  %p836_p9 = por %p62_p7, %p61_p6 }
  0x1b   : > { %p106_p10 = scmp.eq.s32.totalorder %s105_s30, 0  ;;  %s108_s4 = sadd.s32 1, %s697_s11 }
  0x1c   : > { %s1072_s3 = scalar_select %p836_p9, 1, 0 }
  0x1d   : > { %s1103_s29 = smov (!%p43_p8, %s42_s29), 2  ;;  %p118_p11 = scmp.ne.s32.totalorder %s697_s11, %s693_s10 }
  0x1e   : > { %s842_s5 = scalar_select %p106_p10, %s697_s11, %s108_s4  }
  0x1f   : > { %s45_s6 = ssub.s32 %s1099_s25, %s1103_s29  ;;  %p119_p13 = scmp.eq.s32.totalorder %s404_s20, 3 }
  0x20   : > { %p46_p12 = scmp.eq.s32.totalorder %s45_s6, 0  ;;  %p124_p0 = scmp.ne.s32.totalorder %s693_s10, %s689_s9 }
  0x21   : > { %p125_p1 = scmp.eq.s32.totalorder %s405_s21, 3  ;;  %p856_p2 = por %p119_p13, %p118_p11 }
  0x22   : > { %s854_s7 = scalar_select %p46_p12, %s709_s14, %s48_s26  }
  0x23   : > { %s1073_s8 = scalar_select %p856_p2, 1, 0 }
  0x24   : > { %p860_p3 = por %p125_p1, %p124_p0  ;;  %p450_p4 = scmp.lt.s32.totalorder %s729_s19, 4 }
  0x25   : > { %s866_s24 = sand.u32 1, %s709_s14   ;;  %s1060_s20 = sshll.u32 %s1099_s25, 8 }
  0x26   : > { %s1074_s12 = scalar_select %p860_p3, 1, 0 }
  0x27   : > { %s1059_s28 = sshll.u32 %s866_s24, 4  ;;  %s1075_s0 = sld [smem:[#allocation15_spill]] }
  0x28   : > { %s149_s30 = scalar_lea.vmem [#allocation2], %s1059_s28  ;;  %p881_p6 = pnand %p450_p4, %p824_p5 }
  0x29   : > { %s160_s4 = sshll.u32 %s149_s30, 4  ;;  %s885_s4 = int_to_ptr.vmem [resolvable:$true] %s160_s4 }
  0x2a   : > { %p545_p8 = pneg %p881_p6 }
  0x2d   : > { %s875_s29 = scalar_lea.hbm %s1075_s0, %s1060_s20  ;;  %s548_s27 = scalar_lea.hbm %s1075_s0, 768 }
  0x2e   : > { %s543_s21 = scalar_lea.hbm %s875_s29, 256  ;;  %p549_p5 = scmp.lt.u32.totalorder %s875_s29, %s1075_s0 }
  0x2f   : > { %p544_p7 = scmp.ne.s32.totalorder %s875_s29, %s543_s21  ;;  %p550_p12 = scmp.lt.u32.totalorder %s548_s27, %s543_s21 }
  0x30   : > { %p552_p0 = scmp.lt.u32.totalorder %s543_s21, %s875_s29 }
  0x31   : > { %p546_p10 = pnand %p545_p8, %p544_p7  ;;  %p551_p13 = por %p550_p12, %p549_p5 }
  0x33   : > { %p547_p11 = pneg %p546_p10  ;;  %p553_p1 = por %p552_p0, %p551_p13 }
  0x35   : > { %p554_p4 = pnand %p553_p1, %p547_p11 }
  0x37   : > { %557 = shalt.err (!%p554_p4)
}
  0x38   : > { %s558_s23 = scalar_lea.vmem %s885_s4, 256  ;;  %s731_s26 = smov [#allocation2]  }
  0x39   : > { %p559_p7 = scmp.ne.s32.totalorder %s885_s4, %s558_s23  ;;  %s563_s30 = sshll.u32 %s731_s26, 4  ;;  %s564_s30 = int_to_ptr.vmem [resolvable:$false] %s563_s30 }
  0x3a   : > { %s565_s20 = scalar_lea.vmem %s564_s30, 512  ;;  %p566_p2 = scmp.lt.s32.totalorder %s885_s4, %s564_s30 }
  0x3b   : > { %p561_p10 = pnand %p559_p7, %p545_p8  ;;  %p567_p5 = scmp.lt.s32.totalorder %s565_s20, %s558_s23 }
  0x3d   : > { %p562_p3 = pneg %p561_p10  ;;  %p568_p12 = por %p567_p5, %p566_p2 }
  0x3f   : > { %p569_p13 = pnand %p568_p12, %p562_p3 }
  0x41   : > { %572 = shalt.err (!%p569_p13)
}
  0x42   : > { %s732_s28 = smov 128   ;;  %s733_s21 = smov 8  }
  0x43   : > { %s1077_s23 = scalar_lea.sflag [#allocation3], %s866_s24  ;;  %p420_p2 = scmp.ge.s32.totalorder %s729_s19, 1 }
  0x44   : > { %442 = dma.hbm_to_vmem [thread:$0]  (!%p881_p6), %s875_s29, 256, %s885_s4, %s1077_s23, %s732_s28, %s732_s28, %s733_s21  }
  0x45   : > { %p193_p3 = scmp.lt.s32.totalorder %s729_s19, 5  ;;  %s1079_s26 = sshll.u32 %s1099_s25, 8 }
  0x46   : > { %s929_s0 = scalar_lea.hbm %s1056_s1, %s1079_s26  ;;  %s1080_s22 = sshll.u32 %s866_s24, 4 }
  0x47   : > { %p920_p11 = pnand %p420_p2, %p193_p3  ;;  %s174_s18 = scalar_lea.vmem [#allocation5], %s1080_s22 }
  0x48   : > { %s185_s17 = sshll.u32 %s174_s18, 4  ;;  %s171_s29 = scalar_lea.sflag [#allocation6], %s866_s24  ;;  %s933_s17 = int_to_ptr.vmem [resolvable:$true] %s185_s17 }
  0x49   : > { %s573_s4 = scalar_lea.hbm %s929_s0, 256  ;;  %s578_s26 = scalar_lea.hbm %s1056_s1, 768 }
  0x4a   : > { %p574_p0 = scmp.ne.s32.totalorder %s929_s0, %s573_s4  ;;  %p579_p7 = scmp.lt.u32.totalorder %s929_s0, %s1056_s1 }
  0x4b   : > { %p580_p10 = scmp.lt.u32.totalorder %s578_s26, %s573_s4  ;;  %p582_p12 = scmp.lt.u32.totalorder %s573_s4, %s929_s0 }
  0x4c   : > { %p576_p1 = pnand %p574_p0, %p545_p8 }
  0x4d   : > { %p581_p5 = por %p580_p10, %p579_p7 }
  0x4e   : > { %p577_p4 = pneg %p576_p1 }
  0x4f   : > { %p583_p13 = por %p582_p12, %p581_p5 }
  0x51   : > { %p584_p2 = pnand %p583_p13, %p577_p4 }
  0x53   : > { %587 = shalt.err (!%p584_p2)
}
  0x54   : > { %s588_s18 = scalar_lea.vmem %s933_s17, 256  ;;  %s734_s22 = smov [#allocation5]  }
  0x55   : > { %p589_p3 = scmp.ne.s32.totalorder %s933_s17, %s588_s18  ;;  %s593_s25 = sshll.u32 %s734_s22, 4  ;;  %s594_s25 = int_to_ptr.vmem [resolvable:$false] %s593_s25 }
  0x56   : > { %s595_s23 = scalar_lea.vmem %s594_s25, 512  ;;  %p596_p9 = scmp.lt.s32.totalorder %s933_s17, %s594_s25 }
  0x57   : > { %p591_p0 = pnand %p589_p3, %p545_p8  ;;  %p597_p7 = scmp.lt.s32.totalorder %s595_s23, %s588_s18 }
  0x59   : > { %p592_p1 = pneg %p591_p0  ;;  %p598_p10 = por %p597_p7, %p596_p9 }
  0x5b   : > { %p599_p5 = pnand %p598_p10, %p592_p1 }
  0x5d   : > { %602 = shalt.err (!%p599_p5)
}
  0x5e   : > { %445 = dma.hbm_to_vmem [thread:$0]  (!%p881_p6), %s929_s0, 256, %s933_s17, %s171_s29, %s732_s28, %s732_s28, %s733_s21  }
  0x5f   : > { %197 = sbr.rel (%p920_p11) target bundleno = 143 (0x8f), region = 28  ;;  %s199_s4 = sand.u32 (!%p920_p11), 1, %s705_s13  }
  0x60   : > { %s421_s26 = sshll.u32 (!%p920_p11), %s199_s4, 4  ;;  %s200_s30 = scalar_lea.sflag (!%p920_p11), [#allocation3], %s199_s4 }
  0x61   : > { %s203_s20 = scalar_lea.vmem (!%p920_p11), [#allocation2], %s421_s26  ;;  %p1081_p9 = scmp.ne.s32.totalorder (!%p920_p11), %s1072_s3, 0 }
  0x66   : > { %676 = dma.done.wait (%p1081_p9), %s200_s30, 256  }
  0x67   : > { %678 = vsyncadd (%p1081_p9), %s200_s30, 4294967040  ;;  %s209_s6 = scalar_lea.sflag [#allocation6], %s199_s4  ;;  %s212_s24 = scalar_lea.vmem [#allocation5], %s421_s26 }
  0x68   : > { %680 = dma.done.wait (%p1081_p9), %s209_s6, 256  }
  0x69   : > { %682 = vsyncadd (%p1081_p9), %s209_s6, 4294967040  ;;  %s235_s0 = sand.u32 1, %s693_s10   ;;  %p424_p6 = scmp.ne.s32.totalorder %s713_s15, 0 }
  0x6a   : > { %s423_s17 = sshll.u32 %s235_s0, 3  ;;  %vm252_vm0 = vcmask (!%p424_p6), 523264   ;;  %v735_v0 = vmov (!%p424_p6), 0.0  }
  0x6b   : > { %s978_s28 = scalar_lea.vmem [#allocation7], %s423_s17  ;;  %251 = sbr.rel (%p424_p6) target bundleno = 114 (0x72), region = 40 }
  0x6c   : > { %253 = vst.msk [vmem:[%s978_s28] sm:$0xff] (!%p424_p6), %vm252_vm0, %v735_v0 }
  0x72 PF: > { %s425_s21 = sshll.u32 %s717_s16, 1  ;;  %v257_v1 = vlaneseq  ;;  %v265_v2 = vld [vmem:[%s203_s20] sm:$0xff]  ;;  %v266_v3 = vld [vmem:[%s203_s20 + $0x8] sm:$0xff]  ;;  %vm280_vm1 = vcmask 523264   ;;  %s300_s29 = sshll.u32 %s978_s28, 4  ;;  %s992_s29 = int_to_ptr.vmem [resolvable:$true] %s300_s29 }
  0x73   : > { %v267_v4 = vld [vmem:[%s212_s24] sm:$0xff]  ;;  %s255_s3 = sadd.s32 %s713_s15, %s425_s21  ;;  %v268_v5 = vld [vmem:[%s212_s24 + $0x8] sm:$0xff]  ;;  %s428_s15 = sshll.u32 %s717_s16, 7 }
  0x74   : > { %v269_v6 = vsub.f32 %v265_v2, %v267_v4  ;;  %s426_s27 = sshll.u32 %s255_s3, 4  ;;  %v258_v7 = vshrl.u32 %v257_v1, 7  ;;  %v270_v8 = vsub.f32 %v266_v3, %v268_v5  ;;  %v279_v18 = vld [vmem:[%s978_s28] sm:$0xff]  ;;  %s990_s25 = scalar_lea.hbm %s1057_s2, %s428_s15 }
  0x75   : > { %v260_v9 = vstv %s426_s27  ;;  %s287_s23 = scalar_lea.sflag [#allocation4], %s235_s0  ;;  %s603_s4 = scalar_lea.vmem %s992_s29, 128 }
  0x76   : > { %v271_v10 = vmul.f32 %v269_v6, %v269_v6  ;;  %v259_v11 = vadd.s32 8, %v258_v7  ;;  %v261_v12 = vadd.s32 %v260_v9, %v258_v7  ;;  %v272_v13 = vmul.f32 %v270_v8, %v270_v8  ;;  %p604_p8 = scmp.ne.s32.totalorder %s992_s29, %s603_s4  ;;  %p1082_p11 = scmp.ne.s32.totalorder %s1073_s8, 0 }
  0x77   : > { %s736_s16 = smov [#allocation7]  }
  0x78   : > { %v262_v14 = vadd.s32 %v260_v9, %v259_v11  ;;  %vm263_vm2 = vcmp.lt.s32.totalorder %v261_v12, 44  ;;  %p605_p4 = pnand %p604_p8, %p1082_p11  ;;  %s607_s26 = sshll.u32 %s736_s16, 4  ;;  %s608_s26 = int_to_ptr.vmem [resolvable:$false] %s607_s26 }
  0x79   : > { %v277_v15 = vsel %vm263_vm2, %v271_v10, 0.0  ;;  %s609_s30 = scalar_lea.vmem %s608_s26, 256  ;;  %p610_p13 = scmp.lt.s32.totalorder %s992_s29, %s608_s26 }
  0x7a   : > { %vm264_vm3 = vcmp.lt.s32.totalorder %v262_v14, 44  ;;  %v281_v16 = vsel %vm280_vm1, %v277_v15, 0.0  ;;  %p606_p12 = pneg %p605_p4  ;;  %p611_p2 = scmp.lt.s32.totalorder %s609_s30, %s603_s4 }
  0x7b   : > { %v278_v17 = vsel %vm264_vm3, %v272_v13, 0.0 }
  0x7c   : > { %v282_v19 = vsel %vm280_vm1, %v278_v17, 0.0  ;;  %p612_p3 = por %p611_p2, %p610_p13 }
  0x7d   : > { %v283_v20 = vadd.f32 %v282_v19, %v281_v16 }
  0x7e   : > { %p613_p0 = pnand %p612_p3, %p606_p12 }
  0x7f   : > { %v284_v21 = vadd.f32 %v283_v20, %v279_v18 }
  0x81   : > { %285 = vst.msk [vmem:[%s978_s28] sm:$0xff] %vm280_vm1, %v284_v21 }
  0x82   : > { %616 = shalt.err (!%p613_p0)
}
  0x83   : > { %s617_s20 = scalar_lea.hbm %s990_s25, 128  ;;  %s621_s0 = scalar_lea.hbm %s1057_s2, 256 }
  0x84   : > { %p618_p1 = scmp.ne.s32.totalorder %s990_s25, %s617_s20  ;;  %p622_p5 = scmp.lt.u32.totalorder %s990_s25, %s1057_s2 }
  0x85   : > { %p623_p9 = scmp.lt.u32.totalorder %s621_s0, %s617_s20  ;;  %p625_p8 = scmp.lt.u32.totalorder %s617_s20, %s990_s25 }
  0x86   : > { %p619_p7 = pnand %p618_p1, %p1082_p11 }
  0x87   : > { %p624_p6 = por %p623_p9, %p622_p5 }
  0x88   : > { %p620_p10 = pneg %p619_p7 }
  0x89   : > { %p626_p4 = por %p625_p8, %p624_p6 }
  0x8b   : > { %p627_p12 = pnand %p626_p4, %p620_p10 }
  0x8d   : > { %630 = shalt.err (!%p627_p12)
}
  0x8e   : > { %437 = dma.vmem_to_hbm [thread:$0]  (%p1082_p11), %s992_s29, 128, %s990_s25, %s287_s23  }
  0x8f PF: > { %p451_p13 = scmp.ge.s32.totalorder %s729_s19, 2  ;;  %s312_s21 = sand.u32 1, %s689_s9  }
  0x90   : > { %p1083_p2 = scmp.ne.s32.totalorder %s1074_s12, 0  ;;  %s313_s3 = scalar_lea.sflag [#allocation4], %s312_s21 }
  0x92   : > { %p447_p3 = pnand %p451_p13, %p1083_p2 }
  0x94   : > { %684 = dma.done.wait (!%p447_p3), %s313_s3, 128  }
  0x95   : > { %686 = vsyncadd (!%p447_p3), %s313_s3, 4294967168  ;;  %s21_s19 = sadd.s32 1, %s729_s19   ;;  %s1084_s15 = sld [smem:[#allocation11_spill]] }
  0x96   : > { %p18_p0 = scmp.ge.s32.totalorder %s21_s19, 6   ;;  %s1085_s16 = sld [smem:[#allocation12_spill]] }
  0x97   : > { %s1086_s17 = sld [smem:[#allocation13_spill]]  ;;  %s1087_s18 = sld [smem:[#allocation14_spill]] }
  0x98   : > { %s1088_s9 = smov %s693_s10  ;;  %s1089_s10 = smov %s697_s11 }
  0x99   : > { %s1090_s11 = smov %s842_s5  ;;  %s1091_s12 = smov %s705_s13 }
  0x9a   : > { %s1092_s13 = smov %s709_s14  ;;  %s1093_s14 = smov %s854_s7 }
  0x9b   :  { %20 = sbr.rel (!%p18_p0) target bundleno = 13 (0xd), region = 90 }
  0xa2   :  { %318 = vsyncpa [#allocation3], 1 }
  0xa3   :  { %320 = vsyncpa [#allocation3 + $0x1], 1 }
  0xa4   :  { %321 = vsyncpa [#allocation6], 1 }
  0xa5   :  { %323 = vsyncpa [#allocation6 + $0x1], 1 }
  0xa6   :  { %324 = vsyncpa [#allocation4], 1 }
  0xa7   :  { %326 = vsyncpa [#allocation4 + $0x1], 1 }

</bundles_post_ra>
